<compile_context>
chip_gen: v7x
topology: tpu7x:2x2x1
jax: 0.10.0
libtpu: 0.0.40
codegen_flags: <defaults>
</compile_context>

<pallas_src>
import functools

import jax
import jax.numpy as jnp
import numpy as np
from jax.experimental import pallas as pl
from jax.experimental.pallas import tpu as pltpu


def _ceil_to(x, m):
    return -(-x // m) * m


# ---------------------------------------------------------------------------
# Kernel 1: fused  out = relu(X @ W + b)   (MXU path -- used for conv2)
# ---------------------------------------------------------------------------
def _matmul_bias_relu_kernel(x_ref, w_ref, b_ref, o_ref):
    acc = jnp.dot(x_ref[...], w_ref[...], preferred_element_type=jnp.float32)
    acc = acc + b_ref[...]                       # (1, Np) f32, broadcasts
    o_ref[...] = jnp.maximum(acc, 0.0).astype(o_ref.dtype)


# ---------------------------------------------------------------------------
# Kernel 2: conv1 tap accumulation (VPU path, K == 9 -- no MXU, no K padding)
# ---------------------------------------------------------------------------
def _taps_bias_relu_kernel(x_ref, w_ref, b_ref, o_ref):
    x = x_ref[...].astype(jnp.float32)           # (TM, 9)
    w = w_ref[...].astype(jnp.float32)           # (9,  Np)
    acc = b_ref[...]                             # (1,  Np) f32
    for k in range(w.shape[0]):                  # unrolled: 9 broadcast FMAs
        acc = acc + x[:, k:k + 1] * w[k:k + 1, :]
    o_ref[...] = jnp.maximum(acc, 0.0).astype(o_ref.dtype)


# ---------------------------------------------------------------------------
# Shared wrapper: row-tiled pallas_call
# ---------------------------------------------------------------------------
def _fused_layer(x, w, b, *, out_dtype, use_mxu, tm=1024):
    """relu(x @ w + b), tiled over rows.  x:(M,K)  w:(K,Np)  b:(1,Np)."""
    M, K = x.shape
    Kw, Np = w.shape
    assert Kw == K and b.shape == (1, Np)
    tm = max(8, min(tm, _ceil_to(M, 8)))         # shrink tile for tiny inputs
    grid = (pl.cdiv(M, tm),)
    kernel = _matmul_bias_relu_kernel if use_mxu else _taps_bias_relu_kernel
    cost = pl.CostEstimate(
        flops=2 * M * K * Np,
        transcendentals=0,
        bytes_accessed=(M * K * x.dtype.itemsize
                        + K * Np * w.dtype.itemsize
                        + Np * 4
                        + M * Np * np.dtype(out_dtype).itemsize),
    )
    return pl.pallas_call(
        kernel,
        out_shape=jax.ShapeDtypeStruct((M, Np), out_dtype),
        grid=grid,
        in_specs=[
            pl.BlockSpec((tm, K), lambda i: (i, 0)),     # streamed row tiles
            pl.BlockSpec((K, Np), lambda i: (0, 0)),     # resident weights
            pl.BlockSpec((1, Np), lambda i: (0, 0)),     # resident f32 bias
        ],
        out_specs=pl.BlockSpec((tm, Np), lambda i: (i, 0)),
        compiler_params=pltpu.CompilerParams(
            # Independent row tiles -> v7x can shard them over its 2 TCs.
            dimension_semantics=("parallel",),
            # Explicit scoped-VMEM cap; actual use ~13 MiB at C=256, TM=1024
            # in bf16 -> safe on v5e / v6e / v7x.
            vmem_limit_bytes=32 * 1024 * 1024,
        ),
        cost_estimate=cost,
    )(x, w, b)


# ---------------------------------------------------------------------------
# Plain-JAX glue: channels-last im2col for a 3x3 / stride-2 / VALID conv
# ---------------------------------------------------------------------------
def _im2col_nhwc(x, k=3, s=2):
    """x: (B, H, W, C) -> patches (B*Ho*Wo, k*k*C), columns ordered
    (kh, kw, c_in); also returns (Ho, Wo)."""
    B, H, W, C = x.shape
    Ho = (H - k) // s + 1
    Wo = (W - k) // s + 1
    taps = []
    for i in range(k):
        for j in range(k):
            taps.append(x[:, i:i + s * (Ho - 1) + 1:s,
                             j:j + s * (Wo - 1) + 1:s, :])   # (B, Ho, Wo, C)
    patches = jnp.stack(taps, axis=3)                        # (B,Ho,Wo,k*k,C)
    return patches.reshape(B * Ho * Wo, k * k * C), Ho, Wo


# ---------------------------------------------------------------------------
# Parameter prep (done once, off the per-call path)
# ---------------------------------------------------------------------------
def prepare_params(params, compute_dtype=jnp.bfloat16):
    """Reorder conv weights to channels-last patch order (kh, kw, c_in) and
    pad C_out up to a multiple of 128 lanes.  Bias stays f32."""
    w1, b1, w2, b2 = params          # w1:(C,1,3,3) b1:(C,) w2:(C,C,3,3) b2:(C,)
    c_out, c_in1 = w1.shape[0], w1.shape[1]
    np_ = _ceil_to(c_out, 128)
    w1m = jnp.transpose(w1, (2, 3, 1, 0)).reshape(9 * c_in1, c_out)
    w2m = jnp.transpose(w2, (2, 3, 1, 0)).reshape(9 * c_out, c_out)
    w1p = jnp.zeros((w1m.shape[0], np_), compute_dtype).at[:, :c_out].set(
        w1m.astype(compute_dtype))
    w2p = jnp.zeros((w2m.shape[0], np_), compute_dtype).at[:, :c_out].set(
        w2m.astype(compute_dtype))
    b1p = jnp.zeros((1, np_), jnp.float32).at[0, :c_out].set(
        b1.astype(jnp.float32))
    b2p = jnp.zeros((1, np_), jnp.float32).at[0, :c_out].set(
        b2.astype(jnp.float32))
    return (w1p, b1p, w2p, b2p)


# ---------------------------------------------------------------------------
# Conv2dSubsampling forward
# ---------------------------------------------------------------------------
@functools.partial(jax.jit, static_argnames=("num_channels",))
def conv2d_subsampling(inputs, input_lengths, prepared, *, num_channels):
    """inputs: (B, T, D) f32; input_lengths: (B,) int32.
    Returns (outputs (B, T2, C*D2), output_lengths (B,))."""
    w1p, b1p, w2p, b2p = prepared
    cdt = w1p.dtype
    C = num_channels
    B, T, D = inputs.shape

    # conv1 + relu  (channels-last; VPU kernel since K == 9)
    p1, T1, D1 = _im2col_nhwc(inputs[..., None])             # (B*T1*D1, 9)
    y1 = _fused_layer(p1.astype(cdt), w1p, b1p,
                      out_dtype=cdt, use_mxu=False)          # (B*T1*D1, Np)
    y1 = y1[:, :C].reshape(B, T1, D1, C)                     # NHWC, no transpose

    # conv2 + relu  (MXU kernel, K == 9*C, bf16 operands, f32 accumulate)
    p2, T2, D2 = _im2col_nhwc(y1)                            # (B*T2*D2, 9*C) bf16
    y2 = _fused_layer(p2, w2p, b2p,
                      out_dtype=jnp.float32, use_mxu=True)   # (B*T2*D2, Np)
    y2 = y2[:, :C].reshape(B, T2, D2, C)

    # PyTorch: permute(0, 2, 1, 3) + view  ->  (B, T2, C*D2)  (small tensor)
    outputs = jnp.transpose(y2, (0, 1, 3, 2)).reshape(B, T2, C * D2)

    output_lengths = jnp.right_shift(input_lengths, 2) - 1
    return outputs, output_lengths


def init_params(key, in_channels, out_channels):
    assert in_channels == 1, "forward() unsqueezes to a single input channel"
    k1, k2, k3, k4 = jax.random.split(key, 4)
    w1 = jax.random.normal(k1, (out_channels, in_channels, 3, 3),
                           jnp.float32) * 0.1
    b1 = jax.random.normal(k2, (out_channels,), jnp.float32) * 0.1
    w2 = jax.random.normal(k3, (out_channels, out_channels, 3, 3),
                           jnp.float32) * 0.1
    b2 = jax.random.normal(k4, (out_channels,), jnp.float32) * 0.1
    return (w1, b1, w2, b2)


def _reference(inputs, input_lengths, params):
    """Pure-XLA f32 reference of the PyTorch module."""
    w1, b1, w2, b2 = params
    x = inputs[:, None, :, :]                                 # NCHW
    y = jax.lax.conv_general_dilated(
        x, w1, window_strides=(2, 2), padding="VALID",
        dimension_numbers=("NCHW", "OIHW", "NCHW"))
    y = jax.nn.relu(y + b1[None, :, None, None])
    y = jax.lax.conv_general_dilated(
        y, w2, window_strides=(2, 2), padding="VALID",
        dimension_numbers=("NCHW", "OIHW", "NCHW"))
    y = jax.nn.relu(y + b2[None, :, None, None])
    B, C, T2, D2 = y.shape
    out = jnp.transpose(y, (0, 2, 1, 3)).reshape(B, T2, C * D2)
    return out, jnp.right_shift(input_lengths, 2) - 1


if __name__ == "__main__":
    key = jax.random.PRNGKey(0)
    k_in, k_par = jax.random.split(key)

    B, T, D = 2, 16, 16
    in_channels, out_channels = 1, 16

    inputs = jax.random.normal(k_in, (B, T, D), jnp.float32)
    input_lengths = jnp.array([16, 12], dtype=jnp.int32)
    params = init_params(k_par, in_channels, out_channels)
    prepared = prepare_params(params)

    outputs, output_lengths = conv2d_subsampling(
        inputs, input_lengths, prepared, num_channels=out_channels)
    jax.block_until_ready((outputs, output_lengths))

    # Shape sanity: T1 = D1 = 7, T2 = D2 = 3  ->  (2, 3, 16*3)
    assert outputs.shape == (B, 3, out_channels * 3), outputs.shape
    assert output_lengths.shape == (B,), output_lengths.shape

    # Numerics vs the pure-XLA reference (bf16 operands -> loose tolerance).
    ref_out, ref_len = _reference(inputs, input_lengths, params)
    max_err = float(jnp.max(jnp.abs(outputs - ref_out)))
    assert max_err < 5e-2, f"max abs err {max_err}"
    assert bool(jnp.all(output_lengths == ref_len))

    print("KERNEL_OK")
</pallas_src>

<mosaic_0001>
module attributes {stable_mosaic.version = 11 : i64} {
  func.func @_taps_bias_relu_kernel(%arg0: i32, %arg1: memref<104x9xbf16, #tpu.memory_space<vmem>>, %arg2: memref<9x128xbf16, #tpu.memory_space<vmem>>, %arg3: memref<1x128xf32, #tpu.memory_space<vmem>>, %arg4: memref<104x128xbf16, #tpu.memory_space<vmem>>) attributes {dimension_semantics = [#tpu.dimension_semantics<parallel>], iteration_bounds = array<i64: 1>, scalar_prefetch = 0 : i64, scratch_operands = 0 : i64, tpu.core_type = #tpu.core_type<tc>, window_params = [{transform_indices = @transform_0, window_bounds = array<i64: 104, 9>}, {pipeline_mode = #tpu.pipeline_mode<synchronous>, transform_indices = @transform_1, window_bounds = array<i64: 9, 128>}, {pipeline_mode = #tpu.pipeline_mode<synchronous>, transform_indices = @transform_2, window_bounds = array<i64: 1, 128>}, {transform_indices = @transform_3, window_bounds = array<i64: 104, 128>}]} {
    %c0 = arith.constant 0 : index
    %c0_0 = arith.constant 0 : index
    %0 = vector.load %arg1[%c0, %c0_0] : memref<104x9xbf16, #tpu.memory_space<vmem>>, vector<104x9xbf16>
    %1 = arith.extf %0 : vector<104x9xbf16> to vector<104x9xf32>
    %c0_1 = arith.constant 0 : index
    %c0_2 = arith.constant 0 : index
    %2 = vector.load %arg2[%c0_1, %c0_2] : memref<9x128xbf16, #tpu.memory_space<vmem>>, vector<9x128xbf16>
    %3 = arith.extf %2 : vector<9x128xbf16> to vector<9x128xf32>
    %c0_3 = arith.constant 0 : index
    %c0_4 = arith.constant 0 : index
    %4 = vector.load %arg3[%c0_3, %c0_4] : memref<1x128xf32, #tpu.memory_space<vmem>>, vector<1x128xf32>
    %5 = vector.extract_strided_slice %1 {offsets = [0, 0], sizes = [104, 1], strides = [1, 1]} : vector<104x9xf32> to vector<104x1xf32>
    %6 = vector.extract_strided_slice %3 {offsets = [0, 0], sizes = [1, 128], strides = [1, 1]} : vector<9x128xf32> to vector<1x128xf32>
    %7 = vector.broadcast %5 : vector<104x1xf32> to vector<104x128xf32>
    %8 = vector.broadcast %6 : vector<1x128xf32> to vector<104x128xf32>
    %9 = arith.mulf %7, %8 : vector<104x128xf32>
    %10 = vector.broadcast %4 : vector<1x128xf32> to vector<104x128xf32>
    %11 = arith.addf %10, %9 : vector<104x128xf32>
    %12 = vector.extract_strided_slice %1 {offsets = [0, 1], sizes = [104, 1], strides = [1, 1]} : vector<104x9xf32> to vector<104x1xf32>
    %13 = vector.extract_strided_slice %3 {offsets = [1, 0], sizes = [1, 128], strides = [1, 1]} : vector<9x128xf32> to vector<1x128xf32>
    %14 = vector.broadcast %12 : vector<104x1xf32> to vector<104x128xf32>
    %15 = vector.broadcast %13 : vector<1x128xf32> to vector<104x128xf32>
    %16 = arith.mulf %14, %15 : vector<104x128xf32>
    %17 = arith.addf %11, %16 : vector<104x128xf32>
    %18 = vector.extract_strided_slice %1 {offsets = [0, 2], sizes = [104, 1], strides = [1, 1]} : vector<104x9xf32> to vector<104x1xf32>
    %19 = vector.extract_strided_slice %3 {offsets = [2, 0], sizes = [1, 128], strides = [1, 1]} : vector<9x128xf32> to vector<1x128xf32>
    %20 = vector.broadcast %18 : vector<104x1xf32> to vector<104x128xf32>
    %21 = vector.broadcast %19 : vector<1x128xf32> to vector<104x128xf32>
    %22 = arith.mulf %20, %21 : vector<104x128xf32>
    %23 = arith.addf %17, %22 : vector<104x128xf32>
    %24 = vector.extract_strided_slice %1 {offsets = [0, 3], sizes = [104, 1], strides = [1, 1]} : vector<104x9xf32> to vector<104x1xf32>
    %25 = vector.extract_strided_slice %3 {offsets = [3, 0], sizes = [1, 128], strides = [1, 1]} : vector<9x128xf32> to vector<1x128xf32>
    %26 = vector.broadcast %24 : vector<104x1xf32> to vector<104x128xf32>
    %27 = vector.broadcast %25 : vector<1x128xf32> to vector<104x128xf32>
    %28 = arith.mulf %26, %27 : vector<104x128xf32>
    %29 = arith.addf %23, %28 : vector<104x128xf32>
    %30 = vector.extract_strided_slice %1 {offsets = [0, 4], sizes = [104, 1], strides = [1, 1]} : vector<104x9xf32> to vector<104x1xf32>
    %31 = vector.extract_strided_slice %3 {offsets = [4, 0], sizes = [1, 128], strides = [1, 1]} : vector<9x128xf32> to vector<1x128xf32>
    %32 = vector.broadcast %30 : vector<104x1xf32> to vector<104x128xf32>
    %33 = vector.broadcast %31 : vector<1x128xf32> to vector<104x128xf32>
    %34 = arith.mulf %32, %33 : vector<104x128xf32>
    %35 = arith.addf %29, %34 : vector<104x128xf32>
    %36 = vector.extract_strided_slice %1 {offsets = [0, 5], sizes = [104, 1], strides = [1, 1]} : vector<104x9xf32> to vector<104x1xf32>
    %37 = vector.extract_strided_slice %3 {offsets = [5, 0], sizes = [1, 128], strides = [1, 1]} : vector<9x128xf32> to vector<1x128xf32>
    %38 = vector.broadcast %36 : vector<104x1xf32> to vector<104x128xf32>
    %39 = vector.broadcast %37 : vector<1x128xf32> to vector<104x128xf32>
    %40 = arith.mulf %38, %39 : vector<104x128xf32>
    %41 = arith.addf %35, %40 : vector<104x128xf32>
    %42 = vector.extract_strided_slice %1 {offsets = [0, 6], sizes = [104, 1], strides = [1, 1]} : vector<104x9xf32> to vector<104x1xf32>
    %43 = vector.extract_strided_slice %3 {offsets = [6, 0], sizes = [1, 128], strides = [1, 1]} : vector<9x128xf32> to vector<1x128xf32>
    %44 = vector.broadcast %42 : vector<104x1xf32> to vector<104x128xf32>
    %45 = vector.broadcast %43 : vector<1x128xf32> to vector<104x128xf32>
    %46 = arith.mulf %44, %45 : vector<104x128xf32>
    %47 = arith.addf %41, %46 : vector<104x128xf32>
    %48 = vector.extract_strided_slice %1 {offsets = [0, 7], sizes = [104, 1], strides = [1, 1]} : vector<104x9xf32> to vector<104x1xf32>
    %49 = vector.extract_strided_slice %3 {offsets = [7, 0], sizes = [1, 128], strides = [1, 1]} : vector<9x128xf32> to vector<1x128xf32>
    %50 = vector.broadcast %48 : vector<104x1xf32> to vector<104x128xf32>
    %51 = vector.broadcast %49 : vector<1x128xf32> to vector<104x128xf32>
    %52 = arith.mulf %50, %51 : vector<104x128xf32>
    %53 = arith.addf %47, %52 : vector<104x128xf32>
    %54 = vector.extract_strided_slice %1 {offsets = [0, 8], sizes = [104, 1], strides = [1, 1]} : vector<104x9xf32> to vector<104x1xf32>
    %55 = vector.extract_strided_slice %3 {offsets = [8, 0], sizes = [1, 128], strides = [1, 1]} : vector<9x128xf32> to vector<1x128xf32>
    %56 = vector.broadcast %54 : vector<104x1xf32> to vector<104x128xf32>
    %57 = vector.broadcast %55 : vector<1x128xf32> to vector<104x128xf32>
    %58 = arith.mulf %56, %57 : vector<104x128xf32>
    %59 = arith.addf %53, %58 : vector<104x128xf32>
    %cst = arith.constant 0.000000e+00 : f32
    %60 = vector.broadcast %cst : f32 to vector<104x128xf32>
    %61 = arith.maximumf %59, %60 : vector<104x128xf32>
    %62 = arith.truncf %61 : vector<104x128xf32> to vector<104x128xbf16>
    %c0_5 = arith.constant 0 : index
    %c0_6 = arith.constant 0 : index
    %63 = vector.load %arg4[%c0_5, %c0_6] : memref<104x128xbf16, #tpu.memory_space<vmem>>, vector<104x128xbf16>
    tpu.vector_store %arg4[%c0_5, %c0_6], %62 {strides = array<i32>} : memref<104x128xbf16, #tpu.memory_space<vmem>>, vector<104x128xbf16>,
    return
  }
  func.func @transform_0(%arg0: i32) -> (i32, i32) {
    %c0_i32 = arith.constant 0 : i32
    %c0_i32_0 = arith.constant 0 : i32
    return %arg0, %c0_i32 : i32, i32
  }
  func.func @transform_1(%arg0: i32) -> (i32, i32) {
    %c0_i32 = arith.constant 0 : i32
    %c0_i32_0 = arith.constant 0 : i32
    %c0_i32_1 = arith.constant 0 : i32
    return %c0_i32, %c0_i32_0 : i32, i32
  }
  func.func @transform_2(%arg0: i32) -> (i32, i32) {
    %c0_i32 = arith.constant 0 : i32
    %c0_i32_0 = arith.constant 0 : i32
    %c0_i32_1 = arith.constant 0 : i32
    return %c0_i32, %c0_i32_0 : i32, i32
  }
  func.func @transform_3(%arg0: i32) -> (i32, i32) {
    %c0_i32 = arith.constant 0 : i32
    %c0_i32_0 = arith.constant 0 : i32
    return %arg0, %c0_i32 : i32, i32
  }
}

module attributes {stable_mosaic.version = 11 : i64} {
  func.func @_matmul_bias_relu_kernel(%arg0: i32, %arg1: memref<24x144xbf16, #tpu.memory_space<vmem>>, %arg2: memref<144x128xbf16, #tpu.memory_space<vmem>>, %arg3: memref<1x128xf32, #tpu.memory_space<vmem>>, %arg4: memref<24x128xf32, #tpu.memory_space<vmem>>) attributes {dimension_semantics = [#tpu.dimension_semantics<parallel>], iteration_bounds = array<i64: 1>, scalar_prefetch = 0 : i64, scratch_operands = 0 : i64, tpu.core_type = #tpu.core_type<tc>, window_params = [{transform_indices = @transform_0, window_bounds = array<i64: 24, 144>}, {pipeline_mode = #tpu.pipeline_mode<synchronous>, transform_indices = @transform_1, window_bounds = array<i64: 144, 128>}, {pipeline_mode = #tpu.pipeline_mode<synchronous>, transform_indices = @transform_2, window_bounds = array<i64: 1, 128>}, {transform_indices = @transform_3, window_bounds = array<i64: 24, 128>}]} {
    %c0 = arith.constant 0 : index
    %c0_0 = arith.constant 0 : index
    %0 = vector.load %arg1[%c0, %c0_0] : memref<24x144xbf16, #tpu.memory_space<vmem>>, vector<24x144xbf16>
    %c0_1 = arith.constant 0 : index
    %c0_2 = arith.constant 0 : index
    %1 = vector.load %arg2[%c0_1, %c0_2] : memref<144x128xbf16, #tpu.memory_space<vmem>>, vector<144x128xbf16>
    %cst = arith.constant dense<0.000000e+00> : vector<24x128xf32>
    %2 = tpu.matmul %0, %1, %cst {dimension_numbers = #tpu.dot_dimension_numbers<[1], [0], [0], [1], [0, 0, 1, 1], [], []>} : vector<24x144xbf16>, vector<144x128xbf16>, vector<24x128xf32> -> vector<24x128xf32>
    %c0_3 = arith.constant 0 : index
    %c0_4 = arith.constant 0 : index
    %3 = vector.load %arg3[%c0_3, %c0_4] : memref<1x128xf32, #tpu.memory_space<vmem>>, vector<1x128xf32>
    %4 = vector.broadcast %3 : vector<1x128xf32> to vector<24x128xf32>
    %5 = arith.addf %2, %4 : vector<24x128xf32>
    %cst_5 = arith.constant 0.000000e+00 : f32
    %6 = vector.broadcast %cst_5 : f32 to vector<24x128xf32>
    %7 = arith.maximumf %5, %6 : vector<24x128xf32>
    %c0_6 = arith.constant 0 : index
    %c0_7 = arith.constant 0 : index
    %8 = vector.load %arg4[%c0_6, %c0_7] : memref<24x128xf32, #tpu.memory_space<vmem>>, vector<24x128xf32>
    tpu.vector_store %arg4[%c0_6, %c0_7], %7 {strides = array<i32>} : memref<24x128xf32, #tpu.memory_space<vmem>>, vector<24x128xf32>,
    return
  }
  func.func @transform_0(%arg0: i32) -> (i32, i32) {
    %c0_i32 = arith.constant 0 : i32
    %c0_i32_0 = arith.constant 0 : i32
    return %arg0, %c0_i32 : i32, i32
  }
  func.func @transform_1(%arg0: i32) -> (i32, i32) {
    %c0_i32 = arith.constant 0 : i32
    %c0_i32_0 = arith.constant 0 : i32
    %c0_i32_1 = arith.constant 0 : i32
    return %c0_i32, %c0_i32_0 : i32, i32
  }
  func.func @transform_2(%arg0: i32) -> (i32, i32) {
    %c0_i32 = arith.constant 0 : i32
    %c0_i32_0 = arith.constant 0 : i32
    %c0_i32_1 = arith.constant 0 : i32
    return %c0_i32, %c0_i32_0 : i32, i32
  }
  func.func @transform_3(%arg0: i32) -> (i32, i32) {
    %c0_i32 = arith.constant 0 : i32
    %c0_i32_0 = arith.constant 0 : i32
    return %arg0, %c0_i32 : i32, i32
  }
}

</mosaic_0001>

<bundles_post_ra>
// kernel: conv2d_subsampling.2
= control target key start
LH: loop header
LB: loop body
LE: loop exit
PB: predicated region body
PF: predicated region fallthrough
CT: control target
= control target key end

     0   :  { %v1273_v0 = vmov 0   ;;  %v1274_v27 = vmov 1   ;;  %v1275_v28 = vmov 2   ;;  %v1276_v29 = vmov 3   ;;  %s1772_s0 = inlined_call_operand.vmem [shape: bf16[98,9], index: 0, kind: input, shape index: {}]   ;;  %s1773_s1 = inlined_call_operand.vmem [shape: bf16[9,128], index: 1, kind: input, shape index: {}]   ;;  %s1774_s2 = inlined_call_operand.vmem [shape: f32[1,128], index: 2, kind: input, shape index: {}]   ;;  %s1775_s3 = inlined_call_operand.vmem [shape: bf16[98,128], index: 3, kind: output, shape index: {}]  }
   0x1   :  { %996 = vset.pattern.permute.xlu1 %v1273_v0  ;;  %985 = vset.pattern.permute.xlu0 %v1273_v0  ;;  %v967_v1 = vld [vmem:[%s1772_s0 + $0x10] sm:$0xff]   ;;  %v913_v2 = vld [vmem:[%s1772_s0] sm:$0xff]   ;;  %v968_v3 = vld [vmem:[%s1772_s0 + $0x18] sm:$0xff]   ;;  %v1277_v30 = vmov 4   ;;  %v1278_v31 = vmov 5   ;;  %v1279_v32 = vmov 6   ;;  %v110_v35 = vlaneseq }
   0x2   :  { %v922_v4 = vunpack.c.l.bf16 %v967_v1  ;;  %v923_v5 = vunpack.c.h.bf16 %v967_v1  ;;  %v914_v6 = vunpack.c.l.bf16 %v913_v2  ;;  %v915_v7 = vunpack.c.h.bf16 %v913_v2  ;;  %v966_v8 = vld [vmem:[%s1772_s0 + $0x8] sm:$0xff]   ;;  %v969_v14 = vld [vmem:[%s1772_s0 + $0x20] sm:$0xff]   ;;  %v26_v25 = vld [vmem:[%s1772_s0 + $0x30] sm:$0xf] }
   0x3   :  { %v970_v9 = vld [vmem:[%s1772_s0 + $0x28] sm:$0xff]   ;;  %v926_v10 = vunpack.c.l.bf16 %v968_v3  ;;  %v927_v11 = vunpack.c.h.bf16 %v968_v3  ;;  %v918_v12 = vunpack.c.l.bf16 %v966_v8  ;;  %v919_v13 = vunpack.c.h.bf16 %v966_v8  ;;  %v40_v37 = vld [vmem:[%s1773_s1] sm:$0xf] }
   0x4   :  { %v1320_v15 = vpack.i.bf16 %v923_v5, %v922_v4  ;;  %v1322_v16 = vpack.i.bf16 %v915_v7, %v914_v6  ;;  %v934_v17 = vunpack.c.l.bf16 %v970_v9  ;;  %v935_v18 = vunpack.c.h.bf16 %v970_v9  ;;  %v1421_v59 = vld [vmem:[%s1774_s2] ss:$0 sm:$0xff] }
   0x5   :  { %v1326_v19 = vpack.i.bf16 %v927_v11, %v926_v10  ;;  %v1328_v20 = vpack.i.bf16 %v919_v13, %v918_v12  ;;  %v930_v21 = vunpack.c.l.bf16 %v969_v14  ;;  %v931_v22 = vunpack.c.h.bf16 %v969_v14 }
   0x6   :  { %998 = vperm.xlu1 %996, %v1320_v15   ;;  %987 = vperm.xlu0 %985, %v1322_v16   ;;  %v1332_v23 = vpack.i.bf16 %v935_v18, %v934_v17  ;;  %v1341_v26 = vunpack.c.l.bf16 %v26_v25  ;;  %v1280_v33 = vmov 7   ;;  %v1281_v34 = vmov 8  }
   0x7   :  { %v1334_v24 = vpack.i.bf16 %v931_v22, %v930_v21  ;;  %v1395_v36 = vshrl.u32 %v110_v35, 7  ;;  %v1401_v40 = vunpack.c.l.bf16 %v40_v37 }
   0x9   :  { %v112_v41 = vsub.s32 0, %v1395_v36  ;;  %v200_v51 = vsub.s32 1, %v1395_v36 }
   0xa   :  { %1003 = vperm.xlu1 %996, %v1326_v19   ;;  %992 = vperm.xlu0 %985, %v1328_v20  }
   0xb   :  { %v1408_v46 = vrot.slane %v1401_v40, %v112_v41  ;;  %v1424_v62 = vrot.slane %v1401_v40, %v200_v51 }
   0xe   :  { %1013 = vperm.xlu1 %996, %v1332_v23   ;;  %1008 = vperm.xlu0 %985, %v1334_v24  }
  0x12   :  { %1017 = vset.pattern.permute.xlu1 %v1274_v27  ;;  %107 = vperm.xlu0 %985, %v1341_v26  }
  0x13   :  { %1019 = vperm.xlu1 %1017, %v1322_v16  }
  0x16   :  { %1023 = vset.pattern.permute.xlu0 %v1274_v27 }
  0x17   :  { %1030 = vperm.xlu1 %1017, %v1320_v15   ;;  %1025 = vperm.xlu0 %1023, %v1328_v20  }
  0x1b   :  { %1035 = vperm.xlu1 %1017, %v1326_v19   ;;  %1040 = vperm.xlu0 %1023, %v1334_v24  }
  0x1f   :  { %1045 = vperm.xlu1 %1017, %v1332_v23   ;;  %195 = vperm.xlu0 %1023, %v1341_v26  }
  0x23   :  { %1049 = vset.pattern.permute.xlu1 %v1275_v28  ;;  %1055 = vset.pattern.permute.xlu0 %v1275_v28 }
  0x24   :  { %1051 = vperm.xlu1 %1049, %v1322_v16   ;;  %1057 = vperm.xlu0 %1055, %v1328_v20  }
  0x28   :  { %1062 = vperm.xlu1 %1049, %v1320_v15   ;;  %1072 = vperm.xlu0 %1055, %v1334_v24  }
  0x2c   :  { %1067 = vperm.xlu1 %1049, %v1326_v19   ;;  %277 = vperm.xlu0 %1055, %v1341_v26  }
  0x30   :  { %1077 = vperm.xlu1 %1049, %v1332_v23   ;;  %1087 = vset.pattern.permute.xlu0 %v1276_v29 }
  0x31   :  { %1089 = vperm.xlu0 %1087, %v1328_v20  }
  0x34   :  { %1081 = vset.pattern.permute.xlu1 %v1276_v29 }
  0x35   :  { %1083 = vperm.xlu1 %1081, %v1322_v16   ;;  %1104 = vperm.xlu0 %1087, %v1334_v24  }
  0x39   :  { %1094 = vperm.xlu1 %1081, %v1320_v15   ;;  %359 = vperm.xlu0 %1087, %v1341_v26  }
  0x3d   :  { %1099 = vperm.xlu1 %1081, %v1326_v19   ;;  %1119 = vset.pattern.permute.xlu0 %v1277_v30 }
  0x3e   :  { %1121 = vperm.xlu0 %1119, %v1328_v20  }
  0x41   :  { %1109 = vperm.xlu1 %1081, %v1332_v23  }
  0x42   :  { %1136 = vperm.xlu0 %1119, %v1334_v24  }
  0x45   :  { %1113 = vset.pattern.permute.xlu1 %v1277_v30 }
  0x46   :  { %1115 = vperm.xlu1 %1113, %v1322_v16   ;;  %441 = vperm.xlu0 %1119, %v1341_v26  }
  0x4a   :  { %1126 = vperm.xlu1 %1113, %v1320_v15   ;;  %1151 = vset.pattern.permute.xlu0 %v1278_v31 }
  0x4b   :  { %1153 = vperm.xlu0 %1151, %v1328_v20  }
  0x4e   :  { %1131 = vperm.xlu1 %1113, %v1326_v19  }
  0x4f   :  { %1168 = vperm.xlu0 %1151, %v1334_v24  }
  0x52   :  { %1141 = vperm.xlu1 %1113, %v1332_v23  }
  0x53   :  { %523 = vperm.xlu0 %1151, %v1341_v26  }
  0x56   :  { %1145 = vset.pattern.permute.xlu1 %v1278_v31 }
  0x57   :  { %1147 = vperm.xlu1 %1145, %v1322_v16   ;;  %1183 = vset.pattern.permute.xlu0 %v1279_v32 }
  0x58   :  { %1185 = vperm.xlu0 %1183, %v1328_v20  }
  0x5b   :  { %1158 = vperm.xlu1 %1145, %v1320_v15  }
  0x5c   :  { %1200 = vperm.xlu0 %1183, %v1334_v24  }
  0x5f   :  { %1163 = vperm.xlu1 %1145, %v1326_v19  }
  0x60   :  { %605 = vperm.xlu0 %1183, %v1341_v26  }
  0x63   :  { %1173 = vperm.xlu1 %1145, %v1332_v23  }
  0x64   :  { %1215 = vset.pattern.permute.xlu0 %v1280_v33 }
  0x65   :  { %1217 = vperm.xlu0 %1215, %v1328_v20  }
  0x67   :  { %1177 = vset.pattern.permute.xlu1 %v1279_v32 }
  0x68   :  { %1179 = vperm.xlu1 %1177, %v1322_v16  }
  0x69   :  { %1232 = vperm.xlu0 %1215, %v1334_v24  }
  0x6c   :  { %1190 = vperm.xlu1 %1177, %v1320_v15  }
  0x6d   :  { %687 = vperm.xlu0 %1215, %v1341_v26  }
  0x70   :  { %1195 = vperm.xlu1 %1177, %v1326_v19  }
  0x71   :  { %1247 = vset.pattern.permute.xlu0 %v1281_v34 }
  0x72   :  { %1249 = vperm.xlu0 %1247, %v1328_v20  }
  0x74   :  { %1205 = vperm.xlu1 %1177, %v1332_v23  }
  0x76   :  { %1264 = vperm.xlu0 %1247, %v1334_v24  }
  0x78   :  { %1209 = vset.pattern.permute.xlu1 %v1280_v33 }
  0x79   :  { %1211 = vperm.xlu1 %1209, %v1322_v16  }
  0x7a   :  { %769 = vperm.xlu0 %1247, %v1341_v26  }
  0x7d   :  { %1222 = vperm.xlu1 %1209, %v1320_v15  }
  0x81   :  { %1227 = vperm.xlu1 %1209, %v1326_v19  }
  0x85   :  { %v999_v38 = vpop.permute.xlu1 %998  ;;  %1237 = vperm.xlu1 %1209, %v1332_v23   ;;  %v988_v39 = vpop.permute.xlu0 %987 }
  0x86   :  { %v990_v44 = vunpack.i.h.bf16 %v988_v39  ;;  %v989_v45 = vunpack.i.l.bf16 %v988_v39  ;;  %v1001_v47 = vunpack.i.h.bf16 %v999_v38  ;;  %v1000_v48 = vunpack.i.l.bf16 %v999_v38 }
  0x88   :  { %v115_v53 = vmul.f32 %v990_v44, %v1408_v46  ;;  %v114_v54 = vmul.f32 %v989_v45, %v1408_v46  ;;  %v119_v55 = vmul.f32 %v1001_v47, %v1408_v46  ;;  %v118_v56 = vmul.f32 %v1000_v48, %v1408_v46 }
  0x89   :  { %v1004_v42 = vpop.permute.xlu1 %1003  ;;  %1241 = vset.pattern.permute.xlu1 %v1281_v34  ;;  %v993_v43 = vpop.permute.xlu0 %992 }
  0x8a   :  { %1243 = vperm.xlu1 %1241, %v1322_v16   ;;  %v1006_v52 = vunpack.i.h.bf16 %v1004_v42  ;;  %v995_v57 = vunpack.i.h.bf16 %v993_v43  ;;  %v994_v58 = vunpack.i.l.bf16 %v993_v43  ;;  %v1005_v60 = vunpack.i.l.bf16 %v1004_v42 }
  0x8b   :  { %v134_v3 = vadd.f32 %v1421_v59, %v115_v53  ;;  %v133_v4 = vadd.f32 %v1421_v59, %v114_v54  ;;  %v138_v7 = vadd.f32 %v1421_v59, %v119_v55  ;;  %v137_v8 = vadd.f32 %v1421_v59, %v118_v56 }
  0x8c   :  { %v121_v0 = vmul.f32 %v1006_v52, %v1408_v46  ;;  %v117_v9 = vmul.f32 %v995_v57, %v1408_v46  ;;  %v116_v10 = vmul.f32 %v994_v58, %v1408_v46  ;;  %v120_v11 = vmul.f32 %v1005_v60, %v1408_v46 }
  0x8d   :  { %v1410_v49 = vpop.permute.xlu1 %1013  ;;  %v1009_v50 = vpop.permute.xlu0 %1008 }
  0x8e   :  { %1254 = vperm.xlu1 %1241, %v1320_v15   ;;  %v1011_v61 = vunpack.i.h.bf16 %v1009_v50  ;;  %v1010_v1 = vunpack.i.l.bf16 %v1009_v50  ;;  %v140_v15 = vadd.f32 %v1421_v59, %v121_v0  ;;  %v1016_v16 = vunpack.i.h.bf16 %v1410_v49 }
  0x8f   :  { %v1015_v17 = vunpack.i.l.bf16 %v1410_v49  ;;  %v136_v26 = vadd.f32 %v1421_v59, %v117_v9  ;;  %v135_v27 = vadd.f32 %v1421_v59, %v116_v10  ;;  %v139_v30 = vadd.f32 %v1421_v59, %v120_v11 }
  0x90   :  { %v123_v12 = vmul.f32 %v1011_v61, %v1408_v46  ;;  %v122_v18 = vmul.f32 %v1010_v1, %v1408_v46  ;;  %v125_v51 = vmul.f32 %v1016_v16, %v1408_v46  ;;  %v282_v61 = vsub.s32 2, %v1395_v36 }
  0x91   :  { %v108_v63 = vpop.permute.xlu0 %107  ;;  %v124_v52 = vmul.f32 %v1015_v17, %v1408_v46 }
  0x92   :  { %1259 = vperm.xlu1 %1241, %v1326_v19   ;;  %v1020_v2 = vpop.permute.xlu1 %1019  ;;  %v142_v31 = vadd.f32 %v1421_v59, %v123_v12  ;;  %v141_v33 = vadd.f32 %v1421_v59, %v122_v18  ;;  %v126_v34 = vmul.f32 %v1408_v46, %v108_v63  ;;  %v1477_v10 = vrot.slane %v1401_v40, %v282_v61 }
  0x93   :  { %v1022_v5 = vunpack.i.h.bf16 %v1020_v2  ;;  %v1021_v6 = vunpack.i.l.bf16 %v1020_v2 }
  0x94   :  { %v145_v55 = vadd.f32 %v1421_v59, %v126_v34 }
  0x95   :  { %v203_v13 = vmul.f32 %v1022_v5, %v1424_v62  ;;  %v202_v14 = vmul.f32 %v1021_v6, %v1424_v62  ;;  %v144_v5 = vadd.f32 %v1421_v59, %v125_v51  ;;  %v143_v6 = vadd.f32 %v1421_v59, %v124_v52 }
  0x96   :  { %1269 = vperm.xlu1 %1241, %v1332_v23   ;;  %v1031_v19 = vpop.permute.xlu1 %1030  ;;  %v1026_v20 = vpop.permute.xlu0 %1025 }
  0x97   :  { %v215_v21 = vadd.f32 %v202_v14, %v133_v4  ;;  %v216_v22 = vadd.f32 %v203_v13, %v134_v3  ;;  %v1033_v24 = vunpack.i.h.bf16 %v1031_v19  ;;  %v1032_v25 = vunpack.i.l.bf16 %v1031_v19 }
  0x98   :  { %v1028_v28 = vunpack.i.h.bf16 %v1026_v20  ;;  %v1027_v29 = vunpack.i.l.bf16 %v1026_v20 }
  0x99   :  { %v207_v32 = vmul.f32 %v1033_v24, %v1424_v62  ;;  %v206_v23 = vmul.f32 %v1032_v25, %v1424_v62 }
  0x9a   :  { %v205_v35 = vmul.f32 %v1028_v28, %v1424_v62  ;;  %v204_v37 = vmul.f32 %v1027_v29, %v1424_v62  ;;  %v1036_v38 = vpop.permute.xlu1 %1035  ;;  %v1041_v39 = vpop.permute.xlu0 %1040 }
  0x9b   :  { %v220_v42 = vadd.f32 %v207_v32, %v138_v7  ;;  %v219_v43 = vadd.f32 %v206_v23, %v137_v8  ;;  %v1038_v44 = vunpack.i.h.bf16 %v1036_v38  ;;  %v1037_v45 = vunpack.i.l.bf16 %v1036_v38 }
  0x9c   :  { %v1453_v47 = vadd.f32 %v204_v37, %v135_v27  ;;  %v1455_v48 = vadd.f32 %v205_v35, %v136_v26  ;;  %v1043_v49 = vunpack.i.h.bf16 %v1041_v39  ;;  %v1042_v50 = vunpack.i.l.bf16 %v1041_v39 }
  0x9d   :  { %v209_v53 = vmul.f32 %v1038_v44, %v1424_v62  ;;  %v208_v54 = vmul.f32 %v1037_v45, %v1424_v62  ;;  %v364_v44 = vsub.s32 3, %v1395_v36 }
  0x9e   :  { %v211_v56 = vmul.f32 %v1043_v49, %v1424_v62  ;;  %v210_v57 = vmul.f32 %v1042_v50, %v1424_v62  ;;  %v1046_v58 = vpop.permute.xlu1 %1045  ;;  %v196_v60 = vpop.permute.xlu0 %195 }
  0x9f   :  { %v222_v63 = vadd.f32 %v209_v53, %v140_v15  ;;  %v221_v0 = vadd.f32 %v208_v54, %v139_v30  ;;  %v1048_v1 = vunpack.i.h.bf16 %v1046_v58  ;;  %v1047_v2 = vunpack.i.l.bf16 %v1046_v58 }
  0xa0   :  { %v1465_v3 = vadd.f32 %v210_v57, %v141_v33  ;;  %v1467_v46 = vadd.f32 %v211_v56, %v142_v31  ;;  %v214_v4 = vmul.f32 %v1424_v62, %v196_v60  ;;  %v1499_v52 = vrot.slane %v1401_v40, %v364_v44 }
  0xa1   :  { %v213_v7 = vmul.f32 %v1048_v1, %v1424_v62  ;;  %v212_v8 = vmul.f32 %v1047_v2, %v1424_v62  ;;  %v528_v44 = vsub.s32 5, %v1395_v36 }
  0xa2   :  { %v1474_v9 = vadd.f32 %v214_v4, %v145_v55 }
  0xa3   :  { %v226_v11 = vadd.f32 %v213_v7, %v144_v5  ;;  %v225_v12 = vadd.f32 %v212_v8, %v143_v6  ;;  %v1052_v13 = vpop.permute.xlu1 %1051  ;;  %v1479_v14 = vpop.permute.xlu0 %1057 }
  0xa4   :  { %v1054_v15 = vunpack.i.h.bf16 %v1052_v13  ;;  %v1053_v16 = vunpack.i.l.bf16 %v1052_v13 }
  0xa6   :  { %v285_v17 = vmul.f32 %v1054_v15, %v1477_v10  ;;  %v284_v59 = vmul.f32 %v1053_v16, %v1477_v10 }
  0xa7   :  { %v1063_v18 = vpop.permute.xlu1 %1062  ;;  %v1483_v19 = vpop.permute.xlu0 %1072 }
  0xa8   :  { %v297_v62 = vadd.f32 %v284_v59, %v215_v21  ;;  %v298_v20 = vadd.f32 %v285_v17, %v216_v22  ;;  %v1065_v24 = vunpack.i.h.bf16 %v1063_v18  ;;  %v1064_v25 = vunpack.i.l.bf16 %v1063_v18 }
  0xaa   :  { %v289_v26 = vmul.f32 %v1065_v24, %v1477_v10  ;;  %v288_v27 = vmul.f32 %v1064_v25, %v1477_v10 }
  0xab   :  { %v1068_v28 = vpop.permute.xlu1 %1067  ;;  %v1487_v29 = vpop.permute.xlu0 %277 }
  0xac   :  { %v1070_v30 = vunpack.i.h.bf16 %v1068_v28  ;;  %v1069_v31 = vunpack.i.l.bf16 %v1068_v28  ;;  %v301_v32 = vadd.f32 %v288_v27, %v219_v43  ;;  %v302_v23 = vadd.f32 %v289_v26, %v220_v42 }
  0xae   :  { %v291_v33 = vmul.f32 %v1070_v30, %v1477_v10  ;;  %v290_v34 = vmul.f32 %v1069_v31, %v1477_v10 }
  0xaf   :  { %v1078_v35 = vpop.permute.xlu1 %1077 }
  0xb0   :  { %v303_v21 = vadd.f32 %v290_v34, %v221_v0  ;;  %v304_v22 = vadd.f32 %v291_v33, %v222_v63  ;;  %v1080_v37 = vunpack.i.h.bf16 %v1078_v35  ;;  %v1079_v38 = vunpack.i.l.bf16 %v1078_v35  ;;  %v1491_v39 = vpop.permute.xlu0 %1089 }
  0xb2   :  { %v295_v45 = vmul.f32 %v1080_v37, %v1477_v10  ;;  %v294_v49 = vmul.f32 %v1079_v38, %v1477_v10  ;;  %v1059_v38 = vunpack.i.l.bf16 %v1479_v14 }
  0xb4   :  { %v307_v50 = vadd.f32 %v294_v49, %v225_v12  ;;  %v308_v43 = vadd.f32 %v295_v45, %v226_v11  ;;  %v1084_v42 = vpop.permute.xlu1 %1083  ;;  %v1496_v51 = vpop.permute.xlu0 %1104  ;;  %v1060_v49 = vunpack.i.h.bf16 %v1479_v14 }
  0xb5   :  { %v1086_v53 = vunpack.i.h.bf16 %v1084_v42  ;;  %v1085_v54 = vunpack.i.l.bf16 %v1084_v42  ;;  %v41_v42 = vld [vmem:[%s1773_s1 + $0x4] sm:$0x1] }
  0xb7   :  { %v367_v55 = vmul.f32 %v1086_v53, %v1499_v52  ;;  %v366_v56 = vmul.f32 %v1085_v54, %v1499_v52  ;;  %v1075_v53 = vunpack.i.h.bf16 %v1483_v19  ;;  %v692_v54 = vsub.s32 7, %v1395_v36 }
  0xb8   :  { %v1095_v57 = vpop.permute.xlu1 %1094  ;;  %v1503_v58 = vpop.permute.xlu0 %359 }
  0xb9   :  { %v1505_v60 = vadd.f32 %v366_v56, %v297_v62  ;;  %v1507_v61 = vadd.f32 %v367_v55, %v298_v20  ;;  %v1097_v63 = vunpack.i.h.bf16 %v1095_v57  ;;  %v1096_v0 = vunpack.i.l.bf16 %v1095_v57 }
  0xba   :  { %v1092_v55 = vunpack.i.h.bf16 %v1491_v39  ;;  %v1091_v56 = vunpack.i.l.bf16 %v1491_v39  ;;  %v1107_v39 = vunpack.i.h.bf16 %v1496_v51 }
  0xbb   :  { %v371_v1 = vmul.f32 %v1097_v63, %v1499_v52  ;;  %v370_v2 = vmul.f32 %v1096_v0, %v1499_v52  ;;  %v286_v63 = vmul.f32 %v1059_v38, %v1477_v10  ;;  %v1106_v0 = vunpack.i.l.bf16 %v1496_v51 }
  0xbc   :  { %v1100_v4 = vpop.permute.xlu1 %1099 }
  0xbd   :  { %v1511_v5 = vadd.f32 %v370_v2, %v301_v32  ;;  %v1513_v6 = vadd.f32 %v371_v1, %v302_v23  ;;  %v1102_v7 = vunpack.i.h.bf16 %v1100_v4  ;;  %v1101_v8 = vunpack.i.l.bf16 %v1100_v4  ;;  %v1515_v11 = vpop.permute.xlu0 %1121 }
  0xbe   :  { %v1574_v1 = vrot.slane %v1401_v40, %v528_v44  ;;  %v287_v4 = vmul.f32 %v1060_v49, %v1477_v10  ;;  %v299_v38 = vadd.f32 %v286_v63, %v1453_v47  ;;  %v374_v44 = vmul.f32 %v1106_v0, %v1499_v52 }
  0xbf   :  { %v373_v12 = vmul.f32 %v1102_v7, %v1499_v52  ;;  %v372_v13 = vmul.f32 %v1101_v8, %v1499_v52  ;;  %v375_v49 = vmul.f32 %v1107_v39, %v1499_v52 }
  0xc0   :  { %v1110_v15 = vpop.permute.xlu1 %1109 }
  0xc1   :  { %v1519_v16 = vadd.f32 %v372_v13, %v303_v21  ;;  %v1521_v17 = vadd.f32 %v373_v12, %v304_v22  ;;  %v1112_v59 = vunpack.i.h.bf16 %v1110_v15  ;;  %v1111_v18 = vunpack.i.l.bf16 %v1110_v15  ;;  %v1523_v62 = vpop.permute.xlu0 %1136 }
  0xc2   :  { %v446_v22 = vsub.s32 4, %v1395_v36  ;;  %v293_v12 = vmul.f32 %v1075_v53, %v1477_v10  ;;  %v1124_v13 = vunpack.i.h.bf16 %v1515_v11  ;;  %v1123_v15 = vunpack.i.l.bf16 %v1515_v11 }
  0xc3   :  { %v377_v20 = vmul.f32 %v1112_v59, %v1499_v52  ;;  %v376_v24 = vmul.f32 %v1111_v18, %v1499_v52  ;;  %v1588_v59 = vrot.slane %v1401_v40, %v692_v54  ;;  %v296_v18 = vmul.f32 %v1477_v10, %v1487_v29 }
  0xc4   :  { %v1567_v57 = vrot.slane %v1401_v40, %v446_v22  ;;  %v1138_v51 = vunpack.i.l.bf16 %v1523_v62  ;;  %v1139_v11 = vunpack.i.h.bf16 %v1523_v62  ;;  %v306_v47 = vadd.f32 %v293_v12, %v1467_v46 }
  0xc5   :  { %v1527_v25 = vadd.f32 %v376_v24, %v307_v50  ;;  %v1529_v26 = vadd.f32 %v377_v20, %v308_v43  ;;  %v1531_v27 = vpop.permute.xlu1 %1115  ;;  %v442_v28 = vpop.permute.xlu0 %441  ;;  %v1074_v50 = vunpack.i.l.bf16 %v1483_v19  ;;  %v610_v43 = vsub.s32 6, %v1395_v36 }
  0xc6   :  { %v43_v19 = vunpack.c.l.bf16 %v41_v42  ;;  %v369_v20 = vmul.f32 %v1092_v55, %v1499_v52  ;;  %v368_v24 = vmul.f32 %v1091_v56, %v1499_v52  ;;  %v451_v42 = vmul.f32 %v1124_v13, %v1567_v57 }
  0xc7   :  { %v292_v7 = vmul.f32 %v1074_v50, %v1477_v10  ;;  %v1582_v8 = vrot.slane %v1401_v40, %v610_v43  ;;  %v300_v10 = vadd.f32 %v287_v4, %v1455_v48  ;;  %v378_v50 = vmul.f32 %v1499_v52, %v1503_v58 }
  0xc8   :  { %v1602_v40 = vrot.slane %v43_v19, %v112_v41  ;;  %v450_v62 = vmul.f32 %v1123_v15, %v1567_v57  ;;  %v1117_v36 = vunpack.i.l.bf16 %v1531_v27  ;;  %v309_v41 = vadd.f32 %v296_v18, %v1474_v9 }
  0xc9   :  { %v1533_v30 = vpop.permute.xlu1 %1126  ;;  %v305_v29 = vadd.f32 %v292_v7, %v1465_v3  ;;  %v381_v53 = vadd.f32 %v368_v24, %v299_v38  ;;  %v382_v48 = vadd.f32 %v369_v20, %v300_v10  ;;  %v456_v3 = vmul.f32 %v1138_v51, %v1567_v57 }
  0xca   :  { %v1535_v31 = vpop.permute.xlu0 %1153  ;;  %v457_v55 = vmul.f32 %v1139_v11, %v1567_v57  ;;  %v1118_v52 = vunpack.i.h.bf16 %v1531_v27  ;;  %v460_v58 = vmul.f32 %v1567_v57, %v442_v28  ;;  %v388_v56 = vadd.f32 %v375_v49, %v306_v47 }
  0xcb   :  { %v387_v54 = vadd.f32 %v374_v44, %v305_v29  ;;  %v391_v63 = vadd.f32 %v378_v50, %v309_v41  ;;  %v1156_v0 = vunpack.i.h.bf16 %v1535_v31  ;;  %v1155_v19 = vunpack.i.l.bf16 %v1535_v31 }
  0xcc   :  { %v463_v4 = vadd.f32 %v450_v62, %v381_v53  ;;  %v464_v7 = vadd.f32 %v451_v42, %v382_v48  ;;  %v448_v39 = vmul.f32 %v1117_v36, %v1567_v57  ;;  %v1129_v27 = vunpack.i.h.bf16 %v1533_v30 }
  0xcd   :  { %v1537_v32 = vpop.permute.xlu1 %1131  ;;  %v469_v13 = vadd.f32 %v456_v3, %v387_v54  ;;  %v470_v18 = vadd.f32 %v457_v55, %v388_v56  ;;  %v1628_v20 = vmul.f32 %v1118_v52, %v1567_v57  ;;  %v473_v24 = vadd.f32 %v460_v58, %v391_v63 }
  0xce   :  { %v1539_v23 = vpop.permute.xlu0 %1168  ;;  %v533_v38 = vmul.f32 %v1156_v0, %v1574_v1  ;;  %v532_v44 = vmul.f32 %v1155_v19, %v1574_v1  ;;  %v1636_v49 = vadd.f32 %v448_v39, %v1505_v60  ;;  %v1128_v42 = vunpack.i.l.bf16 %v1533_v30 }
  0xcf   :  { %v1170_v12 = vunpack.i.l.bf16 %v1539_v23  ;;  %v1171_v31 = vunpack.i.h.bf16 %v1539_v23  ;;  %v1642_v23 = vmul.f32 %v1129_v27, %v1567_v57 }
  0xd0   :  { %v545_v3 = vadd.f32 %v532_v44, %v463_v4  ;;  %v546_v54 = vadd.f32 %v533_v38, %v464_v7 }
  0xd1   :  { %v1541_v33 = vpop.permute.xlu1 %1141  ;;  %v539_v60 = vmul.f32 %v1171_v31, %v1574_v1 }
  0xd2   :  { %v1543_v34 = vpop.permute.xlu0 %523 }
  0xd3   :  { %v542_v30 = vmul.f32 %v1574_v1, %v1543_v34 }
  0xd5   :  { %v555_v38 = vadd.f32 %v542_v30, %v473_v24 }
  0xd6   :  { %v1545_v35 = vpop.permute.xlu1 %1147 }
  0xd7   :  { %v1547_v21 = vpop.permute.xlu0 %1185 }
  0xd8   :  { %v1188_v28 = vunpack.i.h.bf16 %v1547_v21  ;;  %v1187_v15 = vunpack.i.l.bf16 %v1547_v21  ;;  %v538_v21 = vmul.f32 %v1170_v12, %v1574_v1  ;;  %v552_v12 = vadd.f32 %v539_v60, %v470_v18 }
  0xda   :  { %v1550_v37 = vpop.permute.xlu1 %1158  ;;  %v615_v62 = vmul.f32 %v1188_v28, %v1582_v8  ;;  %v614_v36 = vmul.f32 %v1187_v15, %v1582_v8  ;;  %v551_v52 = vadd.f32 %v538_v21, %v469_v13 }
  0xdb   :  { %v1554_v45 = vpop.permute.xlu0 %1200 }
  0xdc   :  { %v1203_v50 = vunpack.i.h.bf16 %v1554_v45  ;;  %v1202_v47 = vunpack.i.l.bf16 %v1554_v45  ;;  %v627_v0 = vadd.f32 %v614_v36, %v545_v3  ;;  %v628_v19 = vadd.f32 %v615_v62, %v546_v54 }
  0xdd   :  { %v1134_v62 = vunpack.i.h.bf16 %v1537_v32 }
  0xde   :  { %v1569_v14 = vpop.permute.xlu1 %1163  ;;  %v621_v58 = vmul.f32 %v1203_v50, %v1582_v8  ;;  %v620_v56 = vmul.f32 %v1202_v47, %v1582_v8 }
  0xdf   :  { %v1576_v2 = vpop.permute.xlu0 %605 }
  0xe0   :  { %v624_v4 = vmul.f32 %v1582_v8, %v1576_v2  ;;  %v633_v44 = vadd.f32 %v620_v56, %v551_v52  ;;  %v1143_v52 = vunpack.i.l.bf16 %v1541_v33 }
  0xe2   :  { %v1595_v22 = vpop.permute.xlu1 %1173  ;;  %v637_v36 = vadd.f32 %v624_v4, %v555_v38 }
  0xe4   :  { %v1218_v43 = vpop.permute.xlu0 %1217 }
  0xe5   :  { %v1220_v11 = vunpack.i.h.bf16 %v1218_v43  ;;  %v1219_v10 = vunpack.i.l.bf16 %v1218_v43  ;;  %v1133_v43 = vunpack.i.l.bf16 %v1537_v32 }
  0xe7   :  { %v1618_v46 = vpop.permute.xlu1 %1179  ;;  %v697_v45 = vmul.f32 %v1220_v11, %v1588_v59  ;;  %v696_v55 = vmul.f32 %v1219_v10, %v1588_v59  ;;  %v634_v11 = vadd.f32 %v621_v58, %v552_v12 }
  0xe8   :  { %v1233_v9 = vpop.permute.xlu0 %1232 }
  0xe9   :  { %v1235_v41 = vunpack.i.h.bf16 %v1233_v9  ;;  %v1234_v53 = vunpack.i.l.bf16 %v1233_v9  ;;  %v709_v34 = vadd.f32 %v696_v55, %v627_v0  ;;  %v710_v28 = vadd.f32 %v697_v45, %v628_v19 }
  0xea   :  { %v454_v55 = vmul.f32 %v1133_v43, %v1567_v57  ;;  %v462_v19 = vadd.f32 %v1628_v20, %v1507_v61  ;;  %v455_v43 = vmul.f32 %v1134_v62, %v1567_v57  ;;  %v466_v61 = vadd.f32 %v1642_v23, %v1513_v6 }
  0xeb   :  { %v1631_v51 = vpop.permute.xlu1 %1190  ;;  %v703_v7 = vmul.f32 %v1235_v41, %v1588_v59  ;;  %v702_v13 = vmul.f32 %v1234_v53, %v1588_v59  ;;  %v1161_v20 = vunpack.i.h.bf16 %v1550_v37  ;;  %v1175_v23 = vunpack.i.l.bf16 %v1595_v22 }
  0xec   :  { %v688_v29 = vpop.permute.xlu0 %687  ;;  %v468_v6 = vadd.f32 %v455_v43, %v1521_v17 }
  0xed   :  { %v706_v18 = vmul.f32 %v1588_v59, %v688_v29  ;;  %v715_v60 = vadd.f32 %v702_v13, %v633_v44  ;;  %v716_v41 = vadd.f32 %v703_v7, %v634_v11  ;;  %v452_v29 = vmul.f32 %v1128_v42, %v1567_v57 }
  0xee   :  { %v1149_v42 = vunpack.i.l.bf16 %v1545_v35  ;;  %v535_v17 = vmul.f32 %v1161_v20, %v1574_v1 }
  0xef   :  { %v1649_v48 = vpop.permute.xlu1 %1195  ;;  %v719_v30 = vadd.f32 %v706_v18, %v637_v36 }
  0xf0   :  { %v530_v11 = vmul.f32 %v1149_v42, %v1574_v1 }
  0xf1   :  { %v1250_v63 = vpop.permute.xlu0 %1249 }
  0xf2   :  { %v1252_v9 = vunpack.i.h.bf16 %v1250_v63  ;;  %v1251_v39 = vunpack.i.l.bf16 %v1250_v63 }
  0xf3   :  { %v1661_v27 = vpop.permute.xlu1 %1205 }
  0xf4   :  { %v779_v15 = vmul.f32 %v1252_v9, %v1602_v40  ;;  %v778_v31 = vmul.f32 %v1251_v39, %v1602_v40  ;;  %v1144_v9 = vunpack.i.h.bf16 %v1541_v33  ;;  %v1150_v39 = vunpack.i.h.bf16 %v1545_v35 }
  0xf5   :  { %v1265_v10 = vpop.permute.xlu0 %1264  ;;  %v467_v33 = vadd.f32 %v454_v55, %v1519_v16  ;;  %v458_v35 = vmul.f32 %v1143_v52, %v1567_v57  ;;  %v1166_v16 = vunpack.i.h.bf16 %v1569_v14 }
  0xf6   :  { %v791_v21 = vadd.f32 %v778_v31, %v709_v34  ;;  %v792_v2 = vadd.f32 %v779_v15, %v710_v28  ;;  %v1267_v50 = vunpack.i.h.bf16 %v1265_v10  ;;  %v1266_v47 = vunpack.i.l.bf16 %v1265_v10 }
  0xf7   :  { %v465_v34 = vadd.f32 %v452_v29, %v1511_v5  ;;  %v1160_v28 = vunpack.i.l.bf16 %v1550_v37  ;;  %v459_v38 = vmul.f32 %v1144_v9, %v1567_v57  ;;  %v531_v44 = vmul.f32 %v1150_v39, %v1574_v1 }
  0xf8   :  { %v804_v53 = vmax.f32 %v791_v21, 0.0  ;;  %v805_v3 = vmax.f32 %v792_v2, 0.0  ;;  %v785_v54 = vmul.f32 %v1267_v50, %v1602_v40  ;;  %v784_v24 = vmul.f32 %v1266_v47, %v1602_v40  ;;  %v1669_v45 = vpop.permute.xlu1 %1211 }
  0xf9   :  { %v770_v58 = vpop.permute.xlu0 %769  ;;  %v1165_v5 = vunpack.i.l.bf16 %v1569_v14  ;;  %v471_v57 = vadd.f32 %v458_v35, %v1527_v25  ;;  %v1176_v10 = vunpack.i.h.bf16 %v1595_v22  ;;  %v1182_v21 = vunpack.i.h.bf16 %v1618_v46 }
  0xfa   :  { %v944_v32 = vpack.c.bf16 %v805_v3, %v804_v53  ;;  %v797_v56 = vadd.f32 %v784_v24, %v715_v60  ;;  %v798_v63 = vadd.f32 %v785_v54, %v716_v41  ;;  %v788_v0 = vmul.f32 %v1602_v40, %v770_v58 }
  0xfb   :  { %v1181_v2 = vunpack.i.l.bf16 %v1618_v46  ;;  %v534_v14 = vmul.f32 %v1160_v28, %v1574_v1  ;;  %v1193_v50 = vunpack.i.h.bf16 %v1631_v51  ;;  %v1192_v47 = vunpack.i.l.bf16 %v1631_v51 }
  0xfc   :  { %971 = vst [vmem:[%s1775_s3 + $0x8] sm:$0xff] %v944_v32   ;;  %v810_v12 = vmax.f32 %v797_v56, 0.0  ;;  %v811_v4 = vmax.f32 %v798_v63, 0.0  ;;  %v801_v7 = vadd.f32 %v788_v0, %v719_v30  ;;  %v1684_v13 = vpop.permute.xlu1 %1222  ;;  %v472_v25 = vadd.f32 %v459_v38, %v1529_v26 }
  0xfd   :  { %v543_v22 = vadd.f32 %v530_v11, %v1636_v49  ;;  %v544_v62 = vadd.f32 %v531_v44, %v462_v19  ;;  %v536_v36 = vmul.f32 %v1165_v5, %v1574_v1  ;;  %v537_v46 = vmul.f32 %v1166_v16, %v1574_v1 }
  0xfe   :  { %v959_v15 = vpack.c.bf16 %v811_v4, %v810_v12  ;;  %v814_v31 = vmax.f32 %v801_v7, 0.0  ;;  %v540_v60 = vmul.f32 %v1175_v23, %v1574_v1  ;;  %v1214_v41 = vunpack.i.h.bf16 %v1669_v45 }
  0xff   :  { %v1213_v53 = vunpack.i.l.bf16 %v1669_v45  ;;  %v541_v3 = vmul.f32 %v1176_v10, %v1574_v1  ;;  %v613_v54 = vmul.f32 %v1182_v21, %v1582_v8  ;;  %v612_v26 = vmul.f32 %v1181_v2, %v1582_v8 }
 0x100   :  { %974 = vst [vmem:[%s1775_s3 + $0x20] sm:$0xff] %v959_v15   ;;  %v911_v37 = vpack.c.bf16 %v814_v31, %v814_v31  ;;  %v1703_v18 = vpop.permute.xlu1 %1227  ;;  %v1224_v49 = vunpack.i.l.bf16 %v1684_v13  ;;  %v547_v24 = vadd.f32 %v534_v14, %v465_v34  ;;  %v548_v29 = vadd.f32 %v535_v17, %v466_v61 }
 0x101   :  { %v617_v55 = vmul.f32 %v1193_v50, %v1582_v8  ;;  %v616_v52 = vmul.f32 %v1192_v47, %v1582_v8  ;;  %v549_v30 = vadd.f32 %v536_v36, %v467_v33  ;;  %v1198_v58 = vunpack.i.h.bf16 %v1649_v48 }
 0x102   :  { %880 = vst [vmem:[%s1775_s3 + $0x30] sm:$0xf] %v911_v37  ;;  %v1197_v45 = vunpack.i.l.bf16 %v1649_v48  ;;  %v1225_v32 = vunpack.i.h.bf16 %v1684_v13  ;;  %v550_v1 = vadd.f32 %v537_v46, %v468_v6  ;;  %v553_v56 = vadd.f32 %v540_v60, %v471_v57 }
 0x103   :  { %v695_v63 = vmul.f32 %v1214_v41, %v1588_v59  ;;  %v694_v0 = vmul.f32 %v1213_v53, %v1588_v59  ;;  %v554_v19 = vadd.f32 %v541_v3, %v472_v25  ;;  %v625_v9 = vadd.f32 %v612_v26, %v543_v22 }
 0x104   :  { %v1723_v51 = vpop.permute.xlu1 %1237  ;;  %v626_v39 = vadd.f32 %v613_v54, %v544_v62  ;;  %v698_v42 = vmul.f32 %v1224_v49, %v1588_v59  ;;  %v629_v12 = vadd.f32 %v616_v52, %v547_v24  ;;  %v630_v4 = vadd.f32 %v617_v55, %v548_v29 }
 0x105   :  { %v619_v48 = vmul.f32 %v1198_v58, %v1582_v8  ;;  %v618_v13 = vmul.f32 %v1197_v45, %v1582_v8  ;;  %v699_v61 = vmul.f32 %v1225_v32, %v1588_v59  ;;  %v1230_v33 = vunpack.i.h.bf16 %v1703_v18 }
 0x106   :  { %v707_v35 = vadd.f32 %v694_v0, %v625_v9  ;;  %v708_v20 = vadd.f32 %v695_v63, %v626_v39  ;;  %v1208_v31 = vunpack.i.h.bf16 %v1661_v27  ;;  %v1207_v38 = vunpack.i.l.bf16 %v1661_v27 }
 0x107   :  { %v711_v44 = vadd.f32 %v698_v42, %v629_v12  ;;  %v1229_v11 = vunpack.i.l.bf16 %v1703_v18  ;;  %v712_v57 = vadd.f32 %v699_v61, %v630_v4  ;;  %v701_v10 = vmul.f32 %v1230_v33, %v1588_v59 }
 0x108   :  { %v1240_v21 = vunpack.i.h.bf16 %v1723_v51  ;;  %v1239_v2 = vunpack.i.l.bf16 %v1723_v51  ;;  %v632_v47 = vadd.f32 %v619_v48, %v550_v1  ;;  %v623_v18 = vmul.f32 %v1208_v31, %v1582_v8 }
 0x109   :  { %v1244_v43 = vpop.permute.xlu1 %1243  ;;  %v622_v25 = vmul.f32 %v1207_v38, %v1582_v8  ;;  %v700_v22 = vmul.f32 %v1229_v11, %v1588_v59  ;;  %v631_v53 = vadd.f32 %v618_v13, %v549_v30 }
 0x10a   :  { %v1246_v7 = vunpack.i.h.bf16 %v1244_v43  ;;  %v1245_v34 = vunpack.i.l.bf16 %v1244_v43  ;;  %v714_v51 = vadd.f32 %v701_v10, %v632_v47  ;;  %v704_v3 = vmul.f32 %v1239_v2, %v1588_v59 }
 0x10b   :  { %v705_v26 = vmul.f32 %v1240_v21, %v1588_v59  ;;  %v635_v29 = vadd.f32 %v622_v25, %v553_v56  ;;  %v636_v55 = vadd.f32 %v623_v18, %v554_v19  ;;  %v713_v52 = vadd.f32 %v700_v22, %v631_v53 }
 0x10c   :  { %v777_v28 = vmul.f32 %v1246_v7, %v1602_v40  ;;  %v776_v15 = vmul.f32 %v1245_v34, %v1602_v40 }
 0x10d   :  { %v1255_v5 = vpop.permute.xlu1 %1254  ;;  %v717_v0 = vadd.f32 %v704_v3, %v635_v29  ;;  %v718_v9 = vadd.f32 %v705_v26, %v636_v55 }
 0x10e   :  { %v789_v6 = vadd.f32 %v776_v15, %v707_v35  ;;  %v790_v16 = vadd.f32 %v777_v28, %v708_v20  ;;  %v1257_v23 = vunpack.i.h.bf16 %v1255_v5  ;;  %v1256_v37 = vunpack.i.l.bf16 %v1255_v5 }
 0x110   :  { %v802_v17 = vmax.f32 %v789_v6, 0.0  ;;  %v803_v14 = vmax.f32 %v790_v16, 0.0  ;;  %v781_v50 = vmul.f32 %v1257_v23, %v1602_v40  ;;  %v780_v27 = vmul.f32 %v1256_v37, %v1602_v40 }
 0x111   :  { %v1260_v62 = vpop.permute.xlu1 %1259 }
 0x112   :  { %v939_v36 = vpack.c.bf16 %v803_v14, %v802_v17  ;;  %v793_v46 = vadd.f32 %v780_v27, %v711_v44  ;;  %v794_v60 = vadd.f32 %v781_v50, %v712_v57  ;;  %v1262_v41 = vunpack.i.h.bf16 %v1260_v62 }
 0x113   :  { %v1261_v54 = vunpack.i.l.bf16 %v1260_v62 }
 0x114   :  { %940 = vst [vmem:[%s1775_s3] sm:$0xff] %v939_v36   ;;  %v806_v49 = vmax.f32 %v793_v46, 0.0  ;;  %v807_v8 = vmax.f32 %v794_v60, 0.0  ;;  %v783_v24 = vmul.f32 %v1262_v41, %v1602_v40 }
 0x115   :  { %v782_v58 = vmul.f32 %v1261_v54, %v1602_v40  ;;  %v1270_v30 = vpop.permute.xlu1 %1269 }
 0x116   :  { %v949_v45 = vpack.c.bf16 %v807_v8, %v806_v49  ;;  %v796_v32 = vadd.f32 %v783_v24, %v714_v51  ;;  %v1272_v1 = vunpack.i.h.bf16 %v1270_v30  ;;  %v1271_v63 = vunpack.i.l.bf16 %v1270_v30 }
 0x117   :  { %v795_v59 = vadd.f32 %v782_v58, %v713_v52 }
 0x118   :  { %972 = vst [vmem:[%s1775_s3 + $0x10] sm:$0xff] %v949_v45   ;;  %v809_v39 = vmax.f32 %v796_v32, 0.0  ;;  %v787_v42 = vmul.f32 %v1272_v1, %v1602_v40  ;;  %v786_v56 = vmul.f32 %v1271_v63, %v1602_v40 }
 0x119   :  { %v808_v19 = vmax.f32 %v795_v59, 0.0 }
 0x11a   :  { %v799_v43 = vadd.f32 %v786_v56, %v717_v0  ;;  %v800_v12 = vadd.f32 %v787_v42, %v718_v9 }
 0x11b   :  { %v954_v4 = vpack.c.bf16 %v809_v39, %v808_v19 }
 0x11c   :  { %v812_v7 = vmax.f32 %v799_v43, 0.0  ;;  %v813_v34 = vmax.f32 %v800_v12, 0.0 }
 0x11d   :  { %973 = vst [vmem:[%s1775_s3 + $0x18] sm:$0xff] %v954_v4  }
 0x11e   :  { %v964_v48 = vpack.c.bf16 %v813_v34, %v812_v7 }
 0x120   :  { %975 = vst [vmem:[%s1775_s3 + $0x28] sm:$0xff] %v964_v48  }

// kernel: conv2d_subsampling.3
= control target key start
LH: loop header
LB: loop body
LE: loop exit
PB: predicated region body
PF: predicated region fallthrough
CT: control target
= control target key end

     0   :  { %v226_v0 = vmov 0   ;;  %vm112_vm0 = vcmask 130048   ;;  %s295_s1 = inlined_call_operand.vmem [shape: bf16[144,128], index: 1, kind: input, shape index: {}]   ;;  %s296_s0 = inlined_call_operand.vmem [shape: bf16[18,144], index: 0, kind: input, shape index: {}]   ;;  %s297_s2 = inlined_call_operand.vmem [shape: f32[1,128], index: 2, kind: input, shape index: {}]   ;;  %s298_s3 = inlined_call_operand.vmem [shape: f32[18,128], index: 3, kind: output, shape index: {}]  }
   0x1   :  { %119 = vmatprep.subr.bf16.mxu0 %v226_v0  ;;  %193 = vmatprep.subr.bf16.mxu1 %v226_v0  ;;  %v212_v1 = vld [vmem:[%s295_s1] sm:$0xff]   ;;  %v213_v2 = vld [vmem:[%s295_s1 + $0x8] sm:$0xff]   ;;  %v214_v3 = vld [vmem:[%s295_s1 + $0x10] sm:$0xff]  }
   0x2   :  { %120 = vmatpush1.bf16.msra.mxu0 %v212_v1  ;;  %202 = vmatpush1.bf16.msra.mxu1 %v212_v1  ;;  %v215_v4 = vld [vmem:[%s295_s1 + $0x18] sm:$0xff]   ;;  %v223_v5 = vld [vmem:[%s296_s0 + $0x4] ss:$8 sps:$4 sm:$0xff]   ;;  %v17_v6 = vld [vmem:[%s296_s0 + $0x10] sm:$0xff] }
   0x3   :  { %121 = vmatprep.subr.bf16.mxu0 %v226_v0  ;;  %194 = vmatprep.subr.bf16.mxu1 %v226_v0  ;;  %v181_v7 = vcombine.high %v17_v6, %v17_v6  ;;  %v216_v8 = vld [vmem:[%s295_s1 + $0x20] sm:$0xff]   ;;  %v217_v9 = vld [vmem:[%s295_s1 + $0x28] sm:$0xff]   ;;  %v218_v10 = vld [vmem:[%s295_s1 + $0x30] sm:$0xff]   ;;  %v180_v14 = vcombine.low %v17_v6, %v17_v6 }
   0x4   :  { %191 = vmatprep.mubr.msk.bf16.mxu0 %vm112_vm0, %v223_v5  ;;  %v219_v11 = vld [vmem:[%s295_s1 + $0x38] sm:$0xff]   ;;  %v220_v12 = vld [vmem:[%s295_s1 + $0x40] sm:$0xff]  }
   0x5   :  { %192 = vmatprep.mubr.msk.bf16.mxu1 %vm112_vm0, %v181_v7  ;;  %v221_v13 = vld [vmem:[%s296_s0] ss:$8 sps:$4 sm:$0xff]  }
   0x6   :  { %122 = vmatpush1.bf16.msra.mxu0 %v213_v2  ;;  %203 = vmatpush1.bf16.msra.mxu1 %v213_v2  ;;  %v177_v15 = vld [vmem:[%s297_s2] ss:$0 sm:$0xff] }
   0x7   :  { %123 = vmatprep.subr.bf16.mxu0 %v226_v0  ;;  %195 = vmatprep.subr.bf16.mxu1 %v226_v0 }
   0xa   :  { %124 = vmatpush1.bf16.msra.mxu0 %v214_v3  ;;  %204 = vmatpush1.bf16.msra.mxu1 %v214_v3 }
   0xb   :  { %125 = vmatprep.subr.bf16.mxu0 %v226_v0  ;;  %196 = vmatprep.subr.bf16.mxu1 %v226_v0 }
   0xe   :  { %126 = vmatpush1.bf16.msra.mxu0 %v215_v4  ;;  %205 = vmatpush1.bf16.msra.mxu1 %v215_v4 }
   0xf   :  { %127 = vmatprep.subr.bf16.mxu0 %v226_v0  ;;  %197 = vmatprep.subr.bf16.mxu1 %v226_v0 }
  0x12   :  { %128 = vmatpush1.bf16.msra.mxu0 %v216_v8  ;;  %206 = vmatpush1.bf16.msra.mxu1 %v216_v8 }
  0x13   :  { %129 = vmatprep.subr.bf16.mxu0 %v226_v0  ;;  %198 = vmatprep.subr.bf16.mxu1 %v226_v0 }
  0x16   :  { %130 = vmatpush1.bf16.msra.mxu0 %v217_v9  ;;  %207 = vmatpush1.bf16.msra.mxu1 %v217_v9 }
  0x17   :  { %131 = vmatprep.subr.bf16.mxu0 %v226_v0  ;;  %199 = vmatprep.subr.bf16.mxu1 %v226_v0 }
  0x1a   :  { %132 = vmatpush1.bf16.msra.mxu0 %v218_v10  ;;  %208 = vmatpush1.bf16.msra.mxu1 %v218_v10 }
  0x1b   :  { %133 = vmatprep.subr.bf16.mxu0 %v226_v0  ;;  %200 = vmatprep.subr.bf16.mxu1 %v226_v0 }
  0x1e   :  { %134 = vmatpush1.bf16.msra.mxu0 %v219_v11  ;;  %209 = vmatpush1.bf16.msra.mxu1 %v219_v11 }
  0x1f   :  { %135 = vmatprep.subr.bf16.mxu0 %v226_v0  ;;  %201 = vmatprep.subr.bf16.mxu1 %v226_v0 }
  0x22   :  { %136 = vmatpush1.bf16.msra.mxu0 %v220_v12  ;;  %210 = vmatpush1.bf16.msra.mxu1 %v220_v12 }
  0x25   :  { %152 = vmatmul.mubr.bf16.vlgmr.msra.gmra.mrb[0].mxu0 %v221_v13  ;;  %160 = vmatmul.mubr.bf16.vlgmr.msra.gmra.mrb[0].mxu1 %v180_v14 }
  0xf8   :  { %v153_v16 = vpop.f32.mrb[0].mxu0  ;;  %v161_v17 = vpop.f32.mrb[0].mxu1 }
  0xf9   :  { %v154_v18 = vadd.f32 %v177_v15, %v153_v16  ;;  %v162_v19 = vadd.f32 %v177_v15, %v161_v17  ;;  %v155_v20 = vpop.f32.mrb[1].mxu0  ;;  %v163_v21 = vpop.f32.mrb[1].mxu1 }
  0xfa   :  { %v156_v22 = vpop.f32.mrb[2].mxu0  ;;  %v164_v23 = vpop.f32.mrb[2].mxu1 }
  0xfb   :  { %v167_v24 = vmax.f32 %v154_v18, 0.0  ;;  %v169_v25 = vmax.f32 %v162_v19, 0.0  ;;  %v157_v26 = vadd.f32 %v177_v15, %v156_v22  ;;  %v158_v27 = vpop.f32.mrb[3].mxu0  ;;  %v165_v28 = vpop.f32.mrb[3].mxu1 }
  0xfd   :  { %170 = vst [vmem:[%s298_s3] sm:$0xff] %v167_v24  ;;  %172 = vst [vmem:[%s298_s3 + $0x10] sm:$0xff] %v169_v25  ;;  %v168_v29 = vmax.f32 %v157_v26, 0.0 }
  0xff   :  { %171 = vst [vmem:[%s298_s3 + $0x8] sm:$0xff] %v168_v29 }

</bundles_post_ra>
